<compile_context>
chip_gen: v5e
topology: v5e:2x2
jax: 0.10.0
libtpu: 0.0.40
codegen_flags: <defaults>
</compile_context>

<pallas_src>
import functools

import jax
import jax.numpy as jnp
from jax import lax
from jax.experimental import pallas as pl
from jax.experimental.pallas import tpu as pltpu


def _round_up(x: int, m: int) -> int:
    return ((x + m - 1) // m) * m


@functools.lru_cache(maxsize=1)
def _vmem_capacity_bytes() -> int:
    """Per-TensorCore VMEM capacity; conservative fallback = v7x's 64 MiB."""
    try:
        return int(pltpu.get_tpu_info().vmem_capacity_bytes)
    except Exception:
        return 64 << 20


def _sublane(dtype) -> int:
    """Sublane packing of the dtype: 8 rows for 4B, 16 for 2B, 32 for 1B."""
    return max(8, 32 // jnp.dtype(dtype).itemsize)


def _pick_lane_tile(dim_pad: int, max_tile: int) -> int:
    """Largest multiple-of-128 divisor of dim_pad that is <= max_tile."""
    best, t = 128, 128
    while t <= min(dim_pad, max_tile):
        if dim_pad % t == 0:
            best = t
        t += 128
    return best


def _pick_tm(M, sub, tn, tk, N_pad, K_pad, tile_bytes, budget):
    """Row-tile size minimizing modeled HBM traffic, bounded by VMEM budget.

    Traffic model (elements):
      weight re-read once per M-tile row   -> grid_m * N_pad * K_pad
      x re-read once per N-tile column     -> m_total * K_pad * (N_pad // tn)
      output written once                  -> m_total * N_pad
    where m_total includes any M padding, so padding waste is penalized too.
    """
    m8 = _round_up(M, sub)

    cands = set()
    # Exact divisors of m8 (multiples of the sublane) -> zero extra M padding.
    f = 1
    while f * f <= m8:
        if m8 % f == 0:
            for d in (f, m8 // f):
                if d % sub == 0:
                    cands.add(d)
        f += 1
    # Bounded-padding candidates up to 1024 rows (512-1024 is the sweet spot
    # for weight flop/byte on all generations).
    for t in (8, 16, 32, 64, 128, 256, 384, 512, 640, 768, 896, 1024):
        if t % sub == 0 and t <= m8:
            cands.add(t)
    cands.add(sub)

    n_passes_x = N_pad // tn
    best_tm, best_cost = sub, None
    for tm in sorted(cands):
        if tile_bytes(tm) > budget:
            continue
        grid_m = -(-m8 // tm)          # ceil
        m_total = grid_m * tm
        cost = (grid_m * N_pad * K_pad
                + m_total * K_pad * n_passes_x
                + m_total * N_pad)
        if best_cost is None or cost < best_cost or (cost == best_cost and tm > best_tm):
            best_tm, best_cost = tm, cost
    return best_tm


def _linear_kernel(x_ref, w_ref, o_ref, acc_ref):
    # x_ref:   (tm, tk)  tile of flattened input rows
    # w_ref:   (tn, tk)  tile of weight in native (out_features, in_features) layout
    # o_ref:   (tm, tn)  output tile
    # acc_ref: (tm, tn)  f32 accumulator, resident across the K grid axis
    k = pl.program_id(2)

    # Contract last dims of both tiles: (tm, tk) x (tn, tk) -> (tm, tn).
    # TODO(synk): verify via bundle dump that the transposed-RHS contraction
    # does not emit a per-K-step XLU transpose; if it does, pre-transpose W.
    prod = lax.dot_general(
        x_ref[...],
        w_ref[...],
        dimension_numbers=(((1,), (1,)), ((), ())),
        preferred_element_type=jnp.float32,
    )

    @pl.when(k == 0)
    def _():
        acc_ref[...] = prod            # direct write: saves a zero-fill pass

    @pl.when(k > 0)
    def _():
        acc_ref[...] += prod

    @pl.when(k == pl.num_programs(2) - 1)
    def _():
        o_ref[...] = acc_ref[...].astype(o_ref.dtype)


@jax.jit
def linear_forward(x, weight):
    """y = x @ weight.T  (no bias), matching the PyTorch Linear module."""
    out_features, in_features = weight.shape
    assert x.shape[-1] == in_features

    leading = x.shape[:-1]
    x_flat = x.reshape(-1, in_features)
    M, K, N = x_flat.shape[0], in_features, out_features
    out_dtype = x.dtype

    if M == 0:
        # Degenerate: no rows -> empty output, skip the kernel entirely.
        return jnp.zeros((*leading, N), dtype=out_dtype)

    x_item = jnp.dtype(x.dtype).itemsize
    w_item = jnp.dtype(weight.dtype).itemsize
    o_item = jnp.dtype(out_dtype).itemsize
    sub = _sublane(x.dtype)

    # ---- generation-aware VMEM budget ---------------------------------------
    cap = _vmem_capacity_bytes()                 # 64 MiB/TC on v7x, 128 MiB on v5e/v6e
    budget = int(min(cap * 0.45, 48 << 20))      # target working set (dbl-buffered)

    # ---- lane-dim tiling: pad N/K up to multiples of 128 (lane-dense stores,
    #      bounded tiles) instead of falling back to full-dim tiles.
    N_pad = _round_up(N, 128)
    K_pad = _round_up(K, 128)
    tn = _pick_lane_tile(N_pad, 1024)
    tk = _pick_lane_tile(K_pad, 1024)

    def tile_bytes(tm):
        # double-buffered x + W + out tiles, plus the f32 accumulator
        return (2 * tm * tk * x_item + 2 * tn * tk * w_item
                + 2 * tm * tn * o_item + tm * tn * 4)

    tm = _pick_tm(M, sub, tn, tk, N_pad, K_pad, tile_bytes, budget)
    M_pad = _round_up(M, tm)

    # Megacore (v7x = 2 TensorCores): keep at least one parallel axis >= 2.
    if M_pad // tm == 1 and N_pad // tn == 1:
        if tn % 256 == 0:
            tn //= 2
        elif tm % (2 * sub) == 0:
            tm //= 2
            M_pad = _round_up(M, tm)

    # ---- wrapper-side zero padding (only when dims are ragged) --------------
    if M_pad != M or K_pad != K:
        x_flat = jnp.pad(x_flat, ((0, M_pad - M), (0, K_pad - K)))
    w_p = weight
    if N_pad != N or K_pad != K:
        w_p = jnp.pad(weight, ((0, N_pad - N), (0, K_pad - K)))

    grid = (M_pad // tm, N_pad // tn, K_pad // tk)

    ws = tile_bytes(tm)
    # Explicit scoped-VMEM limit: v5e's default is only 16 MiB, so set it so
    # larger tiles compile on every generation while staying well under the
    # physical capacity (64 MiB/TC on v7x).
    vmem_limit = int(min(cap * 0.8, max(2 * ws + (2 << 20), 32 << 20)))

    cost = pl.CostEstimate(
        flops=2 * M_pad * K_pad * N_pad,
        transcendentals=0,
        bytes_accessed=(grid[0] * N_pad * K_pad * w_item       # W read per M-tile row
                        + grid[1] * M_pad * K_pad * x_item     # x read per N-tile col
                        + M_pad * N_pad * o_item),
    )

    out_flat = pl.pallas_call(
        _linear_kernel,
        out_shape=jax.ShapeDtypeStruct((M_pad, N_pad), out_dtype),
        grid_spec=pltpu.PrefetchScalarGridSpec(
            num_scalar_prefetch=0,
            grid=grid,
            in_specs=[
                pl.BlockSpec((tm, tk), lambda i, j, k: (i, k)),   # x rows
                pl.BlockSpec((tn, tk), lambda i, j, k: (j, k)),   # W in native (N, K)
            ],
            out_specs=pl.BlockSpec((tm, tn), lambda i, j, k: (i, j)),
            scratch_shapes=[pltpu.VMEM((tm, tn), jnp.float32)],
        ),
        compiler_params=pltpu.CompilerParams(
            dimension_semantics=("parallel", "parallel", "arbitrary"),
            vmem_limit_bytes=vmem_limit,
        ),
        cost_estimate=cost,
    )(x_flat, w_p)

    if M_pad != M or N_pad != N:
        out_flat = out_flat[:M, :N]
    return out_flat.reshape(*leading, N)


def init_linear_weight(key, in_features, out_features, dtype=jnp.float32):
    """trunc_normal_(mean=0, std=sqrt(2/(in+out)), a=-3*std, b=3*std)"""
    std = jnp.sqrt(2.0 / (in_features + out_features))
    w = jax.random.truncated_normal(
        key, -3.0, 3.0, (out_features, in_features), dtype=jnp.float32
    ) * std
    return w.astype(dtype)


if __name__ == "__main__":
    key = jax.random.PRNGKey(0)
    k_w, k_x = jax.random.split(key)

    batch, seq, in_features, out_features = 2, 8, 32, 64

    weight = init_linear_weight(k_w, in_features, out_features)
    x = jax.random.normal(k_x, (batch, seq, in_features), dtype=jnp.float32)

    y = jax.block_until_ready(linear_forward(x, weight))

    # Sanity check against plain JAX reference.
    y_ref = x @ weight.T
    assert y.shape == (batch, seq, out_features)
    assert jnp.allclose(y, y_ref, atol=1e-5, rtol=1e-5)

    # Ragged M + non-128-aligned N: exercises divisor-aware tm (no padding
    # blow-up) and the N/K padding + output-slice path.
    k_w2, k_x2 = jax.random.split(k_x)
    w2 = init_linear_weight(k_w2, 256, 384)
    x2 = jax.random.normal(k_x2, (4, 130, 256), dtype=jnp.float32)  # M=520
    y2 = jax.block_until_ready(linear_forward(x2, w2))
    assert jnp.allclose(y2, x2 @ w2.T, atol=1e-4, rtol=1e-4)

    print("KERNEL_OK")
</pallas_src>

<mosaic_0001>
module attributes {stable_mosaic.version = 11 : i64} {
  func.func @_linear_kernel(%arg0: i32, %arg1: i32, %arg2: i32, %arg3: memref<8x128xf32, #tpu.memory_space<vmem>>, %arg4: memref<128x128xf32, #tpu.memory_space<vmem>>, %arg5: memref<8x128xf32, #tpu.memory_space<vmem>>, %arg6: memref<8x128xf32, #tpu.memory_space<vmem>>) attributes {dimension_semantics = [#tpu.dimension_semantics<parallel>, #tpu.dimension_semantics<parallel>, #tpu.dimension_semantics<arbitrary>], iteration_bounds = array<i64: 2, 1, 1>, scalar_prefetch = 0 : i64, scratch_operands = 1 : i64, tpu.core_type = #tpu.core_type<tc>, window_params = [{transform_indices = @transform_0, window_bounds = array<i64: 8, 128>}, {transform_indices = @transform_1, window_bounds = array<i64: 128, 128>}, {transform_indices = @transform_2, window_bounds = array<i64: 8, 128>}]} {
    %c0 = arith.constant 0 : index
    %c0_0 = arith.constant 0 : index
    %0 = vector.load %arg3[%c0, %c0_0] : memref<8x128xf32, #tpu.memory_space<vmem>>, vector<8x128xf32>
    %c0_1 = arith.constant 0 : index
    %c0_2 = arith.constant 0 : index
    %1 = vector.load %arg4[%c0_1, %c0_2] : memref<128x128xf32, #tpu.memory_space<vmem>>, vector<128x128xf32>
    %cst = arith.constant dense<0.000000e+00> : vector<8x128xf32>
    %2 = tpu.matmul %0, %1, %cst {dimension_numbers = #tpu.dot_dimension_numbers<[1], [1], [0], [0], [0, 0, 1, 0], [], []>} : vector<8x128xf32>, vector<128x128xf32>, vector<8x128xf32> -> vector<8x128xf32>
    %c0_i32 = arith.constant 0 : i32
    %3 = arith.cmpi eq, %arg2, %c0_i32 : i32
    %4 = arith.extui %3 : i1 to i32
    %c0_i32_3 = arith.constant 0 : i32
    %5 = arith.cmpi ne, %4, %c0_i32_3 : i32
    scf.if %5 {
      %c0_8 = arith.constant 0 : index
      %c0_9 = arith.constant 0 : index
      %12 = vector.load %arg6[%c0_8, %c0_9] : memref<8x128xf32, #tpu.memory_space<vmem>>, vector<8x128xf32>
      tpu.vector_store %arg6[%c0_8, %c0_9], %2 {strides = array<i32>} : memref<8x128xf32, #tpu.memory_space<vmem>>, vector<8x128xf32>,
    } else {
    }
    %c0_i32_4 = arith.constant 0 : i32
    %6 = arith.cmpi sgt, %arg2, %c0_i32_4 : i32
    %7 = arith.extui %6 : i1 to i32
    %c0_i32_5 = arith.constant 0 : i32
    %8 = arith.cmpi ne, %7, %c0_i32_5 : i32
    scf.if %8 {
      %c0_8 = arith.constant 0 : index
      %c0_9 = arith.constant 0 : index
      %12 = vector.load %arg6[%c0_8, %c0_9] : memref<8x128xf32, #tpu.memory_space<vmem>>, vector<8x128xf32>
      %13 = arith.addf %12, %2 : vector<8x128xf32>
      %c0_10 = arith.constant 0 : index
      %c0_11 = arith.constant 0 : index
      %14 = vector.load %arg6[%c0_10, %c0_11] : memref<8x128xf32, #tpu.memory_space<vmem>>, vector<8x128xf32>
      tpu.vector_store %arg6[%c0_10, %c0_11], %13 {strides = array<i32>} : memref<8x128xf32, #tpu.memory_space<vmem>>, vector<8x128xf32>,
    } else {
    }
    %c0_i32_6 = arith.constant 0 : i32
    %9 = arith.cmpi eq, %arg2, %c0_i32_6 : i32
    %10 = arith.extui %9 : i1 to i32
    %c0_i32_7 = arith.constant 0 : i32
    %11 = arith.cmpi ne, %10, %c0_i32_7 : i32
    scf.if %11 {
      %c0_8 = arith.constant 0 : index
      %c0_9 = arith.constant 0 : index
      %12 = vector.load %arg6[%c0_8, %c0_9] : memref<8x128xf32, #tpu.memory_space<vmem>>, vector<8x128xf32>
      %c0_10 = arith.constant 0 : index
      %c0_11 = arith.constant 0 : index
      %13 = vector.load %arg5[%c0_10, %c0_11] : memref<8x128xf32, #tpu.memory_space<vmem>>, vector<8x128xf32>
      tpu.vector_store %arg5[%c0_10, %c0_11], %12 {strides = array<i32>} : memref<8x128xf32, #tpu.memory_space<vmem>>, vector<8x128xf32>,
    } else {
    }
    return
  }
  func.func @transform_0(%arg0: i32, %arg1: i32, %arg2: i32) -> (i32, i32) {
    %c0_i32 = arith.constant 0 : i32
    return %arg0, %arg2 : i32, i32
  }
  func.func @transform_1(%arg0: i32, %arg1: i32, %arg2: i32) -> (i32, i32) {
    %c0_i32 = arith.constant 0 : i32
    return %arg1, %arg2 : i32, i32
  }
  func.func @transform_2(%arg0: i32, %arg1: i32, %arg2: i32) -> (i32, i32) {
    %c0_i32 = arith.constant 0 : i32
    return %arg0, %arg1 : i32, i32
  }
}

</mosaic_0001>

<bundles_post_ra>
// kernel: linear_forward.1
= control target key start
LH: loop header
LB: loop body
LE: loop exit
PB: predicated region body
PF: predicated region fallthrough
CT: control target
= control target key end

     0   :  { %s433_s9 = smov 0   ;;  %s435_s10 = smov 0   ;;  %s518_s0 = inlined_call_operand.vmem [shape: f32[16,128], index: 0, kind: input, shape index: {}]   ;;  %s519_s1 = inlined_call_operand.vmem [shape: f32[128,128], index: 1, kind: input, shape index: {}]   ;;  %s520_s2 = inlined_call_operand.vmem [shape: f32[16,128], index: 2, kind: output, shape index: {}]  }
   0x1   :  { %s437_s11 = smov 0  }
   0x2 LB: > { %s31_s12 = sadd.s32 1, %s412_s10  ;;  %p365_p0 = scmp.ge.s32.totalorder %s416_s11, 1  ;;  %s416_s11 = sphi %s437_s11, %s12_s11   ;;  %s412_s10 = sphi %s435_s10, %s522_s10   ;;  %s408_s9 = sphi %s433_s9, %s521_s9  }
   0x3   : > { %p33_p1 = scmp.ge.s32.totalorder %s31_s12, 2  ;;  %p153_p2 = scmp.lt.s32.totalorder %s416_s11, 3 }
   0x5   : > { %s524_s12 = smov (%p33_p1, %s31_s12), 0  ;;  %p154_p3 = pnand %p365_p0, %p153_p2 }
   0x6   : > { %p187_p4 = scmp.lt.s32.totalorder (!%p154_p3), %s408_s9, 1 }
   0x7   : > { %157 = sbr.rel (%p154_p3) target bundleno = 203 (0xcb), region = 28 }
   0xc   : > { %v226_v0 = vld [vmem:[%s519_s1 + $0x78] sm:$0xff]  ;;  %v225_v1 = vld [vmem:[%s519_s1 + $0x70] sm:$0xff]  ;;  %v224_v2 = vld [vmem:[%s519_s1 + $0x68] sm:$0xff]  ;;  %s526_s9 = smov (!%p187_p4, %s408_s9), 1 }
   0xd   : > { %227 = vmatpush.xpose.msra.mxu0 %v226_v0  ;;  %v223_v3 = vld [vmem:[%s519_s1 + $0x60] sm:$0xff]  ;;  %v222_v4 = vld [vmem:[%s519_s1 + $0x58] sm:$0xff]  ;;  %v221_v5 = vld [vmem:[%s519_s1 + $0x50] sm:$0xff]  ;;  %s366_s19 = sshll.u32 %s526_s9, 3 }
   0xe   : > { %v220_v6 = vld [vmem:[%s519_s1 + $0x48] sm:$0xff]  ;;  %v219_v7 = vld [vmem:[%s519_s1 + $0x40] sm:$0xff]  ;;  %v218_v8 = vld [vmem:[%s519_s1 + $0x38] sm:$0xff]  ;;  %s193_s24 = scalar_lea.vmem %s518_s0, %s366_s19  ;;  %s209_s27 = scalar_lea.vmem %s520_s2, %s366_s19 }
   0xf   : > { %v217_v9 = vld [vmem:[%s519_s1 + $0x30] sm:$0xff]  ;;  %v216_v10 = vld [vmem:[%s519_s1 + $0x28] sm:$0xff]  ;;  %v215_v11 = vld [vmem:[%s519_s1 + $0x20] sm:$0xff] }
  0x10   : > { %v214_v12 = vld [vmem:[%s519_s1 + $0x18] sm:$0xff]  ;;  %v213_v13 = vld [vmem:[%s519_s1 + $0x10] sm:$0xff]  ;;  %v212_v14 = vld [vmem:[%s519_s1 + $0x8] sm:$0xff] }
  0x11   : > { %228 = vmatpush.xpose.msra.mxu0 %v225_v1  ;;  %v211_v15 = vld [vmem:[%s519_s1] sm:$0xff] }
  0x12   : > { %v210_v16 = vld [vmem:[%s193_s24] sm:$0xff] }
  0x15   : > { %229 = vmatpush.xpose.msra.mxu0 %v224_v2 }
  0x19   : > { %230 = vmatpush.xpose.msra.mxu0 %v223_v3 }
  0x1d   : > { %231 = vmatpush.xpose.msra.mxu0 %v222_v4 }
  0x21   : > { %232 = vmatpush.xpose.msra.mxu0 %v221_v5 }
  0x25   : > { %233 = vmatpush.xpose.msra.mxu0 %v220_v6 }
  0x29   : > { %234 = vmatpush.xpose.msra.mxu0 %v219_v7 }
  0x2d   : > { %235 = vmatpush.xpose.msra.mxu0 %v218_v8 }
  0x31   : > { %236 = vmatpush.xpose.msra.mxu0 %v217_v9 }
  0x35   : > { %237 = vmatpush.xpose.msra.mxu0 %v216_v10 }
  0x39   : > { %238 = vmatpush.xpose.msra.mxu0 %v215_v11 }
  0x3d   : > { %239 = vmatpush.xpose.msra.mxu0 %v214_v12 }
  0x41   : > { %240 = vmatpush.xpose.msra.mxu0 %v213_v13 }
  0x45   : > { %241 = vmatpush.xpose.msra.mxu0 %v212_v14 }
  0x49   : > { %242 = vmatpush.xpose.msra.mxu0 %v211_v15 }
  0x4c   : > { %243 = vmatmul.f32.vlgmr.msra.gmra.mxu0 %v210_v16 }
  0xc9   : > { %v244_v17 = vpop.f32.mrf.mxu0 }
  0xca   : > { %263 = vst [vmem:[%s209_s27] sm:$0xff] %v244_v17 }
  0xcb PF: > { %s12_s11 = sadd.s32 1, %s416_s11   ;;  %s521_s9 = smov %s412_s10 }
  0xcc   : > { %p9_p5 = scmp.ge.s32.totalorder %s12_s11, 4   ;;  %s522_s10 = smov %s524_s12 }
  0xce   :  { %11 = sbr.rel (!%p9_p5) target bundleno = 2 (0x2), region = 73 }

</bundles_post_ra>
